<compile_context>
chip_gen: v7x
topology: tpu7x:2x2x1
jax: 0.10.0
libtpu: 0.0.40
codegen_flags: <defaults>
</compile_context>

<pallas_src>
import jax
import jax.numpy as jnp
from jax.experimental import pallas as pl
from jax.experimental.pallas import tpu as pltpu

LANES = 128
MIN_TILE_ROWS = 256          # 128 KiB f32 tile floor
MAX_TILE_ROWS = 4096         # 2 MiB f32 tile; (in+out) x 2 buffers = 8 MiB VMEM
TARGET_GRID_STEPS = 4        # keep >=2 (ideally >=4) grid steps: megacore + pipelining
PALLAS_MIN_BATCH = 64 * 1024 # below this a single fused XLA op is strictly faster


def _linear_1x1_kernel(x_ref, w_ref, b_ref, o_ref):
    """y = x * w + b on one (tile_rows, 128) lane-dense VMEM tile."""
    w = w_ref[0, 0]
    b = b_ref[0, 0]
    x = x_ref[...].astype(jnp.float32)           # f32 arithmetic (v5e VPU has no bf16)
    o_ref[...] = (x * w + b).astype(o_ref.dtype)


def _affine_xla(x, weight, bias):
    """Tiny / ragged work path: one fused XLA elementwise op, no extra copies."""
    w = weight.reshape(()).astype(jnp.float32)
    b = bias.reshape(()).astype(jnp.float32)
    return (x.astype(jnp.float32) * w + b).astype(x.dtype)


def _choose_tile_rows(rows, sub):
    """Tile rows: big enough to hide per-step overhead, small enough for >=4 steps."""
    target = pl.cdiv(rows, TARGET_GRID_STEPS)
    t = max(MIN_TILE_ROWS, min(MAX_TILE_ROWS, target))
    t = ((t + sub - 1) // sub) * sub                      # sublane-packing alignment
    t = min(t, ((rows + sub - 1) // sub) * sub)           # don't exceed what is needed
    return t


def linear_1x1(xs, weight, bias, *, min_pallas_batch=PALLAS_MIN_BATCH):
    """Equivalent of torch.nn.Linear(1, 1)(xs).

    xs:     (B, 1) float
    weight: (1, 1) float   (PyTorch layout: [out_features, in_features])
    bias:   (1,)   float
    """
    B, F = xs.shape
    assert F == 1, "nn.Linear(1, 1) expects a single input feature"
    out_dtype = xs.dtype

    # ---- small-batch fast path ------------------------------------------------
    if B < max(min_pallas_batch, LANES):
        return _affine_xla(xs, weight, bias)

    w_smem = weight.reshape(1, 1).astype(jnp.float32)
    b_smem = bias.reshape(1, 1).astype(jnp.float32)

    # ---- lane-dense zero-copy repack: (B, 1) -> (rows, 128) --------------------
    # Largest prefix whose length is a multiple of 128.  When B % 128 == 0 (the
    # common large-batch case) this is a pure reshape: no pad, no slice, no
    # extra HBM pass on either input or output.
    itemsize = xs.dtype.itemsize
    sub = 8 * max(1, 4 // itemsize)       # sublane packing: 8 f32 / 16 bf16 / 32 i8
    rows = B // LANES
    B_main = rows * LANES
    tail = B - B_main

    x_flat = xs.reshape(B)
    x_main = x_flat if tail == 0 else x_flat[:B_main]
    x2d = x_main.reshape(rows, LANES)

    tile_rows = _choose_tile_rows(rows, sub)
    grid = (pl.cdiv(rows, tile_rows),)    # ragged last block is clipped by Pallas

    out2d = pl.pallas_call(
        _linear_1x1_kernel,
        out_shape=jax.ShapeDtypeStruct((rows, LANES), out_dtype),
        grid=grid,
        in_specs=[
            pl.BlockSpec((tile_rows, LANES), lambda i: (i, 0)),
            pl.BlockSpec(memory_space=pltpu.MemorySpace.SMEM),
            pl.BlockSpec(memory_space=pltpu.MemorySpace.SMEM),
        ],
        out_specs=pl.BlockSpec((tile_rows, LANES), lambda i: (i, 0)),
        compiler_params=pltpu.CompilerParams(
            dimension_semantics=("parallel",),
            vmem_limit_bytes=32 * 1024 * 1024,
        ),
        cost_estimate=pl.CostEstimate(
            flops=2 * rows * LANES,
            transcendentals=0,
            bytes_accessed=2 * rows * LANES * itemsize,
        ),
    )(x2d, w_smem, b_smem)

    y_main = out2d.reshape(B_main)        # zero-copy flatten
    if tail == 0:
        return y_main.reshape(B, 1)
    # Ragged tail (< 128 elements): one fused XLA elementwise op.
    y_tail = _affine_xla(x_flat[B_main:].reshape(tail, 1), weight, bias).reshape(tail)
    return jnp.concatenate([y_main, y_tail]).reshape(B, 1)


if __name__ == "__main__":
    key = jax.random.PRNGKey(0)
    k_x, k_w, k_b, k_x2, k_x3 = jax.random.split(key, 5)

    # Deterministic synthetic parameters (shapes from nn.Linear(1, 1)).
    weight = jax.random.normal(k_w, (1, 1), dtype=jnp.float32)   # [out, in]
    bias = jax.random.normal(k_b, (1,), dtype=jnp.float32)

    def ref(x):
        return x @ weight.T + bias        # same math as torch

    # 1) Shape implied by the module forward: small (batch, 1) input.
    #    (Small batches take the fused-XLA fast path by design.)
    xs_small = jax.random.normal(k_x, (8, 1), dtype=jnp.float32)
    ys_small = linear_1x1(xs_small, weight, bias)
    jax.block_until_ready(ys_small)
    assert ys_small.shape == (8, 1)
    assert jnp.allclose(ys_small, ref(xs_small), atol=1e-6), "small-batch mismatch"

    # 2) Force the Pallas path: multiple-of-128 batch, zero-copy repack,
    #    multi-step grid (grid = 4) exercising the parallel axis + pipeline.
    xs_a = jax.random.normal(k_x2, (131072, 1), dtype=jnp.float32)
    ys_a = linear_1x1(xs_a, weight, bias, min_pallas_batch=0)
    jax.block_until_ready(ys_a)
    assert jnp.allclose(ys_a, ref(xs_a), atol=1e-6), "aligned Pallas path mismatch"

    # 3) Force the Pallas path with a ragged batch: clipped last block + XLA tail.
    xs_b = jax.random.normal(k_x3, (1000, 1), dtype=jnp.float32)
    ys_b = linear_1x1(xs_b, weight, bias, min_pallas_batch=0)
    jax.block_until_ready(ys_b)
    assert jnp.allclose(ys_b, ref(xs_b), atol=1e-6), "ragged Pallas path mismatch"

    print("KERNEL_OK")
</pallas_src>

<mosaic_0001>
module attributes {stable_mosaic.version = 11 : i64} {
  func.func @_linear_1x1_kernel(%arg0: i32, %arg1: memref<256x128xf32, #tpu.memory_space<vmem>>, %arg2: memref<1x1xf32, #tpu.memory_space<smem>>, %arg3: memref<1x1xf32, #tpu.memory_space<smem>>, %arg4: memref<256x128xf32, #tpu.memory_space<vmem>>) attributes {dimension_semantics = [#tpu.dimension_semantics<parallel>], iteration_bounds = array<i64: 4>, scalar_prefetch = 0 : i64, scratch_operands = 0 : i64, tpu.core_type = #tpu.core_type<tc>, window_params = [{transform_indices = @transform_0, window_bounds = array<i64: 256, 128>}, {transform_indices = @transform_1, window_bounds = array<i64: 1, 1>}, {transform_indices = @transform_2, window_bounds = array<i64: 1, 1>}, {transform_indices = @transform_3, window_bounds = array<i64: 256, 128>}]} {
    %c0 = arith.constant 0 : index
    %c0_0 = arith.constant 0 : index
    %0 = memref.load %arg2[%c0, %c0_0] : memref<1x1xf32, #tpu.memory_space<smem>>
    %c0_1 = arith.constant 0 : index
    %c0_2 = arith.constant 0 : index
    %1 = memref.load %arg3[%c0_1, %c0_2] : memref<1x1xf32, #tpu.memory_space<smem>>
    %c0_3 = arith.constant 0 : index
    %c0_4 = arith.constant 0 : index
    %2 = vector.load %arg1[%c0_3, %c0_4] : memref<256x128xf32, #tpu.memory_space<vmem>>, vector<256x128xf32>
    %3 = vector.broadcast %0 : f32 to vector<256x128xf32>
    %4 = arith.mulf %2, %3 : vector<256x128xf32>
    %5 = vector.broadcast %1 : f32 to vector<256x128xf32>
    %6 = arith.addf %4, %5 : vector<256x128xf32>
    %c0_5 = arith.constant 0 : index
    %c0_6 = arith.constant 0 : index
    %7 = vector.load %arg4[%c0_5, %c0_6] : memref<256x128xf32, #tpu.memory_space<vmem>>, vector<256x128xf32>
    tpu.vector_store %arg4[%c0_5, %c0_6], %6 {strides = array<i32>} : memref<256x128xf32, #tpu.memory_space<vmem>>, vector<256x128xf32>,
    return
  }
  func.func @transform_0(%arg0: i32) -> (i32, i32) {
    %c0_i32 = arith.constant 0 : i32
    %c0_i32_0 = arith.constant 0 : i32
    return %arg0, %c0_i32 : i32, i32
  }
  func.func @transform_1(%arg0: i32) -> (i32, i32) {
    %c0_i32 = arith.constant 0 : i32
    %c0_i32_0 = arith.constant 0 : i32
    %c0_i32_1 = arith.constant 0 : i32
    return %c0_i32, %c0_i32_0 : i32, i32
  }
  func.func @transform_2(%arg0: i32) -> (i32, i32) {
    %c0_i32 = arith.constant 0 : i32
    %c0_i32_0 = arith.constant 0 : i32
    %c0_i32_1 = arith.constant 0 : i32
    return %c0_i32, %c0_i32_0 : i32, i32
  }
  func.func @transform_3(%arg0: i32) -> (i32, i32) {
    %c0_i32 = arith.constant 0 : i32
    %c0_i32_0 = arith.constant 0 : i32
    return %arg0, %c0_i32 : i32, i32
  }
}

</mosaic_0001>

<bundles_post_ra>
// kernel: tpu_custom_call.1
= control target key start
LH: loop header
LB: loop body
LE: loop exit
PB: predicated region body
PF: predicated region fallthrough
CT: control target
= control target key end

     0   :  { %s909_s0 = inlined_call_operand.hbm [shape: f32[1024,128], index: 0, kind: input, shape index: {}]   ;;  %s910_s1 = inlined_call_operand.<no memory space> [shape: f32[1,1], index: 1, kind: input, shape index: {}]   ;;  %s911_s2 = inlined_call_operand.<no memory space> [shape: f32[1,1], index: 2, kind: input, shape index: {}]   ;;  %s912_s3 = inlined_call_operand.hbm [shape: f32[1024,128], index: 3, kind: output, shape index: {}]  }
   0x1   :  { %8 = sst [smem:[#allocation2]] %s910_s1 }
   0x2   :  { %9 = sst [smem:[#allocation3]] %s911_s2 }
   0x3   :  { %10 = vsyncpa [#allocation5], 0 }
   0x4   :  { %12 = vsyncpa [#allocation5 + $0x1], 0 }
   0x5   :  { %13 = vsyncpa [#allocation6], 0 }
   0x6   :  { %15 = vsyncpa [#allocation6 + $0x1], 0  ;;  %s608_s16 = smov 0   ;;  %s610_s17 = smov 0  }
   0x7   :  { %s612_s18 = smov 0   ;;  %s614_s19 = smov 0  }
   0x8 LB: > { %s629_s1 = sadd.s32 4294967295, %s574_s19   ;;  %s412_s2 = sadd.s32 4294967294, %s574_s19   ;;  %s574_s19 = sphi %s614_s19, %s924_s19   ;;  %s570_s18 = sphi %s612_s18, %s923_s18   ;;  %s566_s17 = sphi %s610_s17, %s922_s17   ;;  %s562_s16 = sphi %s608_s16, %s921_s16  }
   0x9   : > { %s633_s20 = sadd.s32 1, %s574_s19   ;;  %s28_s21 = sadd.s32 1, %s570_s18 }
   0xa   : > { %s25_s22 = ssub.s32 %s574_s19, %s633_s20  ;;  %p35_p0 = scmp.ne.s32.totalorder %s570_s18, %s566_s17 }
   0xb   : > { %p26_p1 = scmp.eq.s32.totalorder %s25_s22, 0  ;;  %p36_p2 = scmp.eq.s32.totalorder %s574_s19, 0 }
   0xc   : > { %p41_p3 = scmp.ne.s32.totalorder %s566_s17, %s562_s16  ;;  %p42_p4 = scmp.eq.s32.totalorder %s629_s1, 0 }
   0xd   : > { %s645_s23 = scalar_select %p26_p1, %s570_s18, %s28_s21  }
   0xe   : > { %p647_p5 = por %p36_p2, %p35_p0  ;;  %p651_p6 = por %p42_p4, %p41_p3 }
   0xf   : > { %p107_p7 = scmp.eq.s32.totalorder %s629_s1, 3  ;;  %p113_p8 = scmp.eq.s32.totalorder %s412_s2, 3 }
  0x10   : > { %p440_p9 = scmp.lt.s32.totalorder %s574_s19, 4  ;;  %s139_s28 = sand.u32 1, %s570_s18  }
  0x11   : > { %p657_p10 = por %p107_p7, %p35_p0  ;;  %p661_p11 = por %p113_p8, %p41_p3 }
  0x12   : > { %s426_s29 = sshll.u32 %s574_s19, 12  ;;  %s415_s30 = sshll.u32 %s139_s28, 8 }
  0x13   : > { %s916_s26 = scalar_select %p657_p10, 1, 0 }
  0x14   : > { %s917_s27 = scalar_select %p661_p11, 1, 0 }
  0x15   : > { %s670_s6 = scalar_lea.hbm %s909_s0, %s426_s29  ;;  %s143_s7 = scalar_lea.vmem [#allocation4], %s415_s30 }
  0x16   : > { %s150_s8 = sshll.u32 %s143_s7, 4  ;;  %p674_p12 = pnand %p440_p9, %p647_p5  ;;  %s678_s8 = int_to_ptr.vmem [resolvable:$true] %s150_s8 }
  0x17   : > { %s680_s10 = scalar_lea.sflag [#allocation5], %s139_s28  ;;  %s478_s11 = scalar_lea.hbm %s670_s6, 4096 }
  0x18   : > { %p479_p13 = scmp.ne.s32.totalorder %s670_s6, %s478_s11  ;;  %p480_p0 = pneg %p674_p12 }
  0x19   : > { %s483_s14 = scalar_lea.hbm %s909_s0, 16384  ;;  %p484_p3 = scmp.lt.u32.totalorder %s670_s6, %s909_s0 }
  0x1a   : > { %p481_p1 = pnand %p480_p0, %p479_p13  ;;  %p485_p4 = scmp.lt.u32.totalorder %s483_s14, %s478_s11 }
  0x1b   : > { %p487_p7 = scmp.lt.u32.totalorder %s478_s11, %s670_s6 }
  0x1c   : > { %p482_p2 = pneg %p481_p1  ;;  %p486_p5 = por %p485_p4, %p484_p3 }
  0x1e   : > { %p488_p8 = por %p487_p7, %p486_p5 }
  0x20   : > { %p489_p9 = pnand %p488_p8, %p482_p2 }
  0x22   : > { %492 = shalt.err (!%p489_p9)
}
  0x23   : > { %s493_s21 = scalar_lea.vmem %s678_s8, 4096  ;;  %s576_s22 = smov [#allocation4]  }
  0x24   : > { %p494_p13 = scmp.ne.s32.totalorder %s678_s8, %s493_s21  ;;  %s498_s24 = sshll.u32 %s576_s22, 4  ;;  %s499_s24 = int_to_ptr.vmem [resolvable:$false] %s498_s24 }
  0x25   : > { %s500_s28 = scalar_lea.vmem %s499_s24, 8192  ;;  %p501_p10 = scmp.lt.s32.totalorder %s678_s8, %s499_s24 }
  0x26   : > { %p496_p1 = pnand %p494_p13, %p480_p0  ;;  %p502_p3 = scmp.lt.s32.totalorder %s500_s28, %s493_s21 }
  0x28   : > { %p497_p11 = pneg %p496_p1  ;;  %p503_p4 = por %p502_p3, %p501_p10 }
  0x2a   : > { %p504_p5 = pnand %p503_p4, %p497_p11 }
  0x2c   : > { %507 = shalt.err (!%p504_p5)
}
  0x2d   : > { %s577_s29 = smov 128   ;;  %s578_s30 = smov 8  }
  0x2e   : > { %435 = dma.hbm_to_vmem [thread:$0]  (!%p674_p12), %s670_s6, 4096, %s678_s8, %s680_s10, %s577_s29, %s577_s29, %s578_s30  }
  0x2f   : > { %p418_p0 = scmp.ge.s32.totalorder %s574_s19, 1  ;;  %p158_p2 = scmp.lt.s32.totalorder %s574_s19, 5 }
  0x31   : > { %p159_p7 = pnand %p418_p0, %p158_p2 }
  0x32   : > { %s711_s4 = sand.u32 (!%p159_p7), 1, %s566_s17  }
  0x33   : > { %162 = sbr.rel (%p159_p7) target bundleno = 102 (0x66), region = 32  ;;  %s419_s5 = sshll.u32 (!%p159_p7), %s711_s4, 8 }
  0x34   : > { %s165_s7 = scalar_lea.sflag (!%p159_p7), [#allocation5], %s711_s4  ;;  %s717_s11 = scalar_lea.vmem (!%p159_p7), [#allocation4], %s419_s5 }
  0x3a   : > { %553 = dma.done.wait (%p651_p6), %s165_s7, 4096  }
  0x3b   : > { %555 = vsyncadd (%p651_p6), %s165_s7, 4294963200  ;;  %s193_s6 = sld [smem:[#allocation2]]  ;;  %v195_v0 = vld [vmem:[%s717_s11] sm:$0xff]  ;;  %v196_v3 = vld [vmem:[%s717_s11 + $0x8] sm:$0xff]  ;;  %s756_s25 = scalar_lea.vmem [#allocation7], %s419_s5 }
  0x3c   : > { %s194_s8 = sld [smem:[#allocation3]]  ;;  %v197_v6 = vld [vmem:[%s717_s11 + $0x10] sm:$0xff]  ;;  %v198_v7 = vld [vmem:[%s717_s11 + $0x18] sm:$0xff]  ;;  %v199_v8 = vld [vmem:[%s717_s11 + $0x20] sm:$0xff]  ;;  %s427_s9 = sshll.u32 %s629_s1, 12 }
  0x3d   : > { %v200_v12 = vld [vmem:[%s717_s11 + $0x28] sm:$0xff]  ;;  %v201_v13 = vld [vmem:[%s717_s11 + $0x30] sm:$0xff]  ;;  %v202_v14 = vld [vmem:[%s717_s11 + $0x38] sm:$0xff]  ;;  %s339_s10 = sshll.u32 %s756_s25, 4  ;;  %s857_s13 = scalar_lea.hbm %s912_s3, %s427_s9  ;;  %s859_s10 = int_to_ptr.vmem [resolvable:$true] %s339_s10 }
  0x3e   : > { %v203_v19 = vld [vmem:[%s717_s11 + $0x40] sm:$0xff]  ;;  %v204_v20 = vld [vmem:[%s717_s11 + $0x48] sm:$0xff]  ;;  %v205_v21 = vld [vmem:[%s717_s11 + $0x50] sm:$0xff]  ;;  %s326_s14 = scalar_lea.sflag [#allocation6], %s711_s4  ;;  %s508_s15 = scalar_lea.vmem %s859_s10, 4096 }
  0x3f   : > { %v206_v26 = vld [vmem:[%s717_s11 + $0x58] sm:$0xff]  ;;  %v207_v27 = vld [vmem:[%s717_s11 + $0x60] sm:$0xff]  ;;  %v208_v28 = vld [vmem:[%s717_s11 + $0x68] sm:$0xff]  ;;  %p509_p6 = scmp.ne.s32.totalorder %s859_s10, %s508_s15  ;;  %p919_p10 = scmp.ne.s32.totalorder %s916_s26, 0 }
  0x40   : > { %v209_v33 = vld [vmem:[%s717_s11 + $0x70] sm:$0xff]  ;;  %v210_v34 = vld [vmem:[%s717_s11 + $0x78] sm:$0xff]  ;;  %v211_v39 = vld [vmem:[%s717_s11 + $0x80] sm:$0xff]  ;;  %s579_s2 = smov [#allocation7]  }
  0x41   : > { %v724_v1 = vstv %s193_s6  ;;  %v212_v40 = vld [vmem:[%s717_s11 + $0x88] sm:$0xff]  ;;  %v213_v45 = vld [vmem:[%s717_s11 + $0x90] sm:$0xff]  ;;  %v214_v46 = vld [vmem:[%s717_s11 + $0x98] sm:$0xff]  ;;  %p510_p11 = pnand %p509_p6, %p919_p10  ;;  %s512_s21 = sshll.u32 %s579_s2, 4  ;;  %s513_s21 = int_to_ptr.vmem [resolvable:$false] %s512_s21 }
  0x42   : > { %v726_v2 = vstv %s194_s8  ;;  %v228_v4 = vmul.f32 %v724_v1, %v195_v0  ;;  %v229_v5 = vmul.f32 %v724_v1, %v196_v3  ;;  %v230_v9 = vmul.f32 %v724_v1, %v197_v6  ;;  %v215_v47 = vld [vmem:[%s717_s11 + $0xa0] sm:$0xff]  ;;  %v216_v52 = vld [vmem:[%s717_s11 + $0xa8] sm:$0xff]  ;;  %v217_v53 = vld [vmem:[%s717_s11 + $0xb0] sm:$0xff]  ;;  %s514_s22 = scalar_lea.vmem %s513_s21, 8192  ;;  %p515_p8 = scmp.lt.s32.totalorder %s859_s10, %s513_s21 }
  0x43   : > { %v231_v10 = vmul.f32 %v724_v1, %v198_v7  ;;  %v232_v11 = vmul.f32 %v724_v1, %v199_v8  ;;  %v233_v17 = vmul.f32 %v724_v1, %v200_v12  ;;  %v234_v18 = vmul.f32 %v724_v1, %v201_v13  ;;  %v218_v58 = vld [vmem:[%s717_s11 + $0xb8] sm:$0xff]  ;;  %v219_v63 = vld [vmem:[%s717_s11 + $0xc0] sm:$0xff]  ;;  %v220_v0 = vld [vmem:[%s717_s11 + $0xc8] sm:$0xff]  ;;  %p511_p12 = pneg %p510_p11  ;;  %p516_p9 = scmp.lt.s32.totalorder %s514_s22, %s508_s15 }
  0x44   : > { %v261_v15 = vadd.f32 %v726_v2, %v228_v4  ;;  %v262_v16 = vadd.f32 %v726_v2, %v229_v5  ;;  %v263_v22 = vadd.f32 %v726_v2, %v230_v9  ;;  %v235_v25 = vmul.f32 %v724_v1, %v202_v14  ;;  %v221_v7 = vld [vmem:[%s717_s11 + $0xd0] sm:$0xff]  ;;  %v222_v8 = vld [vmem:[%s717_s11 + $0xd8] sm:$0xff]  ;;  %v223_v9 = vld [vmem:[%s717_s11 + $0xe0] sm:$0xff] }
  0x45   : > { %v264_v23 = vadd.f32 %v726_v2, %v231_v10  ;;  %v265_v24 = vadd.f32 %v726_v2, %v232_v11  ;;  %v266_v29 = vadd.f32 %v726_v2, %v233_v17  ;;  %v267_v30 = vadd.f32 %v726_v2, %v234_v18  ;;  %v224_v14 = vld [vmem:[%s717_s11 + $0xe8] sm:$0xff]  ;;  %p517_p13 = por %p516_p9, %p515_p8 }
  0x46   : > { %293 = vst [vmem:[%s756_s25] sm:$0xff] %v261_v15  ;;  %294 = vst [vmem:[%s756_s25 + $0x8] sm:$0xff] %v262_v16  ;;  %v236_v31 = vmul.f32 %v724_v1, %v203_v19  ;;  %v237_v32 = vmul.f32 %v724_v1, %v204_v20  ;;  %v268_v35 = vadd.f32 %v726_v2, %v235_v25  ;;  %v225_v15 = vld [vmem:[%s717_s11 + $0xf0] sm:$0xff]  ;;  %v226_v20 = vld [vmem:[%s717_s11 + $0xf8] sm:$0xff] }
  0x47   : > { %295 = vst [vmem:[%s756_s25 + $0x10] sm:$0xff] %v263_v22  ;;  %296 = vst [vmem:[%s756_s25 + $0x18] sm:$0xff] %v264_v23  ;;  %v238_v36 = vmul.f32 %v724_v1, %v205_v21  ;;  %v239_v37 = vmul.f32 %v724_v1, %v206_v26  ;;  %v240_v38 = vmul.f32 %v724_v1, %v207_v27  ;;  %p518_p1 = pnand %p517_p13, %p511_p12 }
  0x48   : > { %297 = vst [vmem:[%s756_s25 + $0x20] sm:$0xff] %v265_v24  ;;  %298 = vst [vmem:[%s756_s25 + $0x28] sm:$0xff] %v266_v29  ;;  %v269_v41 = vadd.f32 %v726_v2, %v236_v31  ;;  %v270_v42 = vadd.f32 %v726_v2, %v237_v32  ;;  %v241_v43 = vmul.f32 %v724_v1, %v208_v28 }
  0x49   : > { %299 = vst [vmem:[%s756_s25 + $0x30] sm:$0xff] %v267_v30  ;;  %v242_v44 = vmul.f32 %v724_v1, %v209_v33  ;;  %300 = vst [vmem:[%s756_s25 + $0x38] sm:$0xff] %v268_v35  ;;  %v271_v48 = vadd.f32 %v726_v2, %v238_v36  ;;  %v272_v49 = vadd.f32 %v726_v2, %v239_v37 }
  0x4a   : > { %v273_v50 = vadd.f32 %v726_v2, %v240_v38  ;;  %v243_v51 = vmul.f32 %v724_v1, %v210_v34  ;;  %301 = vst [vmem:[%s756_s25 + $0x40] sm:$0xff] %v269_v41  ;;  %302 = vst [vmem:[%s756_s25 + $0x48] sm:$0xff] %v270_v42  ;;  %v274_v54 = vadd.f32 %v726_v2, %v241_v43 }
  0x4b   : > { %v275_v55 = vadd.f32 %v726_v2, %v242_v44  ;;  %v244_v56 = vmul.f32 %v724_v1, %v211_v39  ;;  %v245_v57 = vmul.f32 %v724_v1, %v212_v40  ;;  %303 = vst [vmem:[%s756_s25 + $0x50] sm:$0xff] %v271_v48  ;;  %304 = vst [vmem:[%s756_s25 + $0x58] sm:$0xff] %v272_v49 }
  0x4c   : > { %305 = vst [vmem:[%s756_s25 + $0x60] sm:$0xff] %v273_v50  ;;  %v276_v59 = vadd.f32 %v726_v2, %v243_v51  ;;  %v246_v60 = vmul.f32 %v724_v1, %v213_v45  ;;  %v247_v61 = vmul.f32 %v724_v1, %v214_v46  ;;  %v248_v62 = vmul.f32 %v724_v1, %v215_v47 }
  0x4d   : > { %306 = vst [vmem:[%s756_s25 + $0x68] sm:$0xff] %v274_v54  ;;  %307 = vst [vmem:[%s756_s25 + $0x70] sm:$0xff] %v275_v55  ;;  %v277_v3 = vadd.f32 %v726_v2, %v244_v56  ;;  %v278_v4 = vadd.f32 %v726_v2, %v245_v57  ;;  %v249_v5 = vmul.f32 %v724_v1, %v216_v52 }
  0x4e   : > { %v250_v6 = vmul.f32 %v724_v1, %v217_v53  ;;  %308 = vst [vmem:[%s756_s25 + $0x78] sm:$0xff] %v276_v59  ;;  %v279_v10 = vadd.f32 %v726_v2, %v246_v60  ;;  %v280_v11 = vadd.f32 %v726_v2, %v247_v61  ;;  %v281_v12 = vadd.f32 %v726_v2, %v248_v62 }
  0x4f   : > { %v251_v13 = vmul.f32 %v724_v1, %v218_v58  ;;  %309 = vst [vmem:[%s756_s25 + $0x80] sm:$0xff] %v277_v3  ;;  %310 = vst [vmem:[%s756_s25 + $0x88] sm:$0xff] %v278_v4  ;;  %v282_v16 = vadd.f32 %v726_v2, %v249_v5  ;;  %v252_v18 = vmul.f32 %v724_v1, %v219_v63 }
  0x50   : > { %v283_v17 = vadd.f32 %v726_v2, %v250_v6  ;;  %v253_v19 = vmul.f32 %v724_v1, %v220_v0  ;;  %311 = vst [vmem:[%s756_s25 + $0x90] sm:$0xff] %v279_v10  ;;  %312 = vst [vmem:[%s756_s25 + $0x98] sm:$0xff] %v280_v11  ;;  %v254_v22 = vmul.f32 %v724_v1, %v221_v7 }
  0x51   : > { %313 = vst [vmem:[%s756_s25 + $0xa0] sm:$0xff] %v281_v12  ;;  %v284_v21 = vadd.f32 %v726_v2, %v251_v13  ;;  %v255_v23 = vmul.f32 %v724_v1, %v222_v8  ;;  %v256_v24 = vmul.f32 %v724_v1, %v223_v9  ;;  %314 = vst [vmem:[%s756_s25 + $0xa8] sm:$0xff] %v282_v16 }
  0x52   : > { %315 = vst [vmem:[%s756_s25 + $0xb0] sm:$0xff] %v283_v17  ;;  %v285_v25 = vadd.f32 %v726_v2, %v252_v18  ;;  %v286_v26 = vadd.f32 %v726_v2, %v253_v19  ;;  %v257_v27 = vmul.f32 %v724_v1, %v224_v14  ;;  %v258_v28 = vmul.f32 %v724_v1, %v225_v15 }
  0x53   : > { %316 = vst [vmem:[%s756_s25 + $0xb8] sm:$0xff] %v284_v21  ;;  %v287_v29 = vadd.f32 %v726_v2, %v254_v22  ;;  %v288_v30 = vadd.f32 %v726_v2, %v255_v23  ;;  %v289_v31 = vadd.f32 %v726_v2, %v256_v24  ;;  %v259_v32 = vmul.f32 %v724_v1, %v226_v20 }
  0x54   : > { %317 = vst [vmem:[%s756_s25 + $0xc0] sm:$0xff] %v285_v25  ;;  %318 = vst [vmem:[%s756_s25 + $0xc8] sm:$0xff] %v286_v26  ;;  %v290_v33 = vadd.f32 %v726_v2, %v257_v27  ;;  %v291_v34 = vadd.f32 %v726_v2, %v258_v28 }
  0x55   : > { %319 = vst [vmem:[%s756_s25 + $0xd0] sm:$0xff] %v287_v29  ;;  %320 = vst [vmem:[%s756_s25 + $0xd8] sm:$0xff] %v288_v30  ;;  %v292_v1 = vadd.f32 %v726_v2, %v259_v32 }
  0x56   : > { %321 = vst [vmem:[%s756_s25 + $0xe0] sm:$0xff] %v289_v31  ;;  %322 = vst [vmem:[%s756_s25 + $0xe8] sm:$0xff] %v290_v33 }
  0x57   : > { %323 = vst [vmem:[%s756_s25 + $0xf0] sm:$0xff] %v291_v34  ;;  %324 = vst [vmem:[%s756_s25 + $0xf8] sm:$0xff] %v292_v1 }
  0x58   : > { %521 = shalt.err (!%p518_p1)
}
  0x59   : > { %s522_s24 = scalar_lea.hbm %s857_s13, 4096  ;;  %s526_s30 = scalar_lea.hbm %s912_s3, 16384 }
  0x5a   : > { %p523_p3 = scmp.ne.s32.totalorder %s857_s13, %s522_s24  ;;  %p527_p0 = scmp.lt.u32.totalorder %s857_s13, %s912_s3 }
  0x5b   : > { %p528_p2 = scmp.lt.u32.totalorder %s526_s30, %s522_s24  ;;  %p530_p6 = scmp.lt.u32.totalorder %s522_s24, %s857_s13 }
  0x5c   : > { %p524_p4 = pnand %p523_p3, %p919_p10 }
  0x5d   : > { %p529_p7 = por %p528_p2, %p527_p0 }
  0x5e   : > { %p525_p5 = pneg %p524_p4 }
  0x5f   : > { %p531_p11 = por %p530_p6, %p529_p7 }
  0x61   : > { %p532_p12 = pnand %p531_p11, %p525_p5 }
  0x63   : > { %535 = shalt.err (!%p532_p12)
}
  0x64   : > { %s580_s11 = smov 128   ;;  %s581_s6 = smov 8  }
  0x65   : > { %430 = dma.vmem_to_hbm [thread:$0]  (%p919_p10), %s859_s10, 4096, %s857_s13, %s326_s14, %s580_s11, %s580_s11, %s581_s6  }
  0x66 PF: > { %p441_p8 = scmp.ge.s32.totalorder %s574_s19, 2  ;;  %s354_s8 = sand.u32 1, %s562_s16  }
  0x67   : > { %p920_p9 = scmp.ne.s32.totalorder %s917_s27, 0  ;;  %s355_s25 = scalar_lea.sflag [#allocation6], %s354_s8 }
  0x69   : > { %p437_p13 = pnand %p441_p8, %p920_p9 }
  0x6b   : > { %557 = dma.done.wait (!%p437_p13), %s355_s25, 4096  }
  0x6c   : > { %559 = vsyncadd (!%p437_p13), %s355_s25, 4294963200  ;;  %p18_p1 = scmp.ge.s32.totalorder %s633_s20, 6   ;;  %s921_s16 = smov %s566_s17 }
  0x6d   : > { %s922_s17 = smov %s570_s18  ;;  %s923_s18 = smov %s645_s23 }
  0x6e   : > { %s924_s19 = smov %s633_s20  ;;  %20 = sbr.rel (!%p18_p1) target bundleno = 8 (0x8), region = 77 }
  0x75   :  { %360 = vsyncpa [#allocation5], 1 }
  0x76   :  { %362 = vsyncpa [#allocation5 + $0x1], 1 }
  0x77   :  { %363 = vsyncpa [#allocation6], 1 }
  0x78   :  { %365 = vsyncpa [#allocation6 + $0x1], 1 }

</bundles_post_ra>
